<compile_context>
chip_gen: v6e
topology: v6e:2x2x1
jax: 0.10.0
libtpu: 0.0.40
codegen_flags: <defaults>
</compile_context>

<pallas_src>
import functools

import jax
import jax.numpy as jnp
from jax import lax
from jax.experimental import pallas as pl
from jax.experimental.pallas import tpu as pltpu


# ---------------------------------------------------------------------------
# Kernels
# ---------------------------------------------------------------------------

def _epilogue(acc, bias_row, x_res, x2, out_ref, explain_ref):
    """Bias + ReLU + gated sigmoid + residual + explain, all in f32."""
    a = jnp.maximum(acc + bias_row, 0.0)                       # relu(linear(x))
    # s[a > 0] = sigmoid(a[a > 0]); 0 elsewhere.  a >= 0 so exp(-a) is safe.
    # Reciprocal routed to the EUP (approx) instead of a VALU divide sequence.
    s = jnp.where(a > 0.0, pl.reciprocal(1.0 + jnp.exp(-a), approx=True), 0.0)
    xf = x_res.astype(jnp.float32)
    x2f = x2.astype(jnp.float32)
    out_ref[...] = (xf * (1.0 + s) * x2f).astype(out_ref.dtype)    # (x + x*s) * x_2
    explain_ref[...] = (x2f + a).astype(explain_ref.dtype)


def _fused_kernel(x_ref, wt_ref, b_ref, x2_ref, out_ref, explain_ref, *, tn):
    # x_ref  : (tm, D)   activations (matmul operand AND residual source)
    # wt_ref : (D, tn)   weight pre-transposed to (in, out) layout
    # b_ref  : (1, tn)   bias
    # x2_ref : (tm, tn)  x_2 tile (epilogue only)
    acc = lax.dot_general(
        x_ref[...], wt_ref[...],
        dimension_numbers=(((1,), (0,)), ((), ())),
        preferred_element_type=jnp.float32)
    if tn == x_ref.shape[1]:
        # N collapsed: the residual tile is the whole x block (static full load).
        x_res = x_ref[...]
    else:
        # N tiled: 128-aligned dynamic lane slice of the matmul operand block.
        col = pl.multiple_of(pl.program_id(1) * tn, tn)
        x_res = x_ref[:, pl.ds(col, tn)]
    _epilogue(acc, b_ref[...], x_res, x2_ref[...], out_ref, explain_ref)


def _ktiled_kernel(x_mm_ref, wt_ref, b_ref, x_res_ref, x2_ref,
                   out_ref, explain_ref, acc_ref):
    """Fallback for D too large to hold a full-K block in VMEM."""
    k = pl.program_id(2)

    @pl.when(k == 0)
    def _init():
        acc_ref[...] = jnp.zeros_like(acc_ref)

    acc_ref[...] += lax.dot_general(
        x_mm_ref[...], wt_ref[...],
        dimension_numbers=(((1,), (0,)), ((), ())),
        preferred_element_type=jnp.float32)

    @pl.when(k == pl.num_programs(2) - 1)
    def _finalize():
        _epilogue(acc_ref[...], b_ref[...], x_res_ref[...], x2_ref[...],
                  out_ref, explain_ref)


# ---------------------------------------------------------------------------
# Tiling helpers
# ---------------------------------------------------------------------------

def _aligned_divisors(dim, align):
    divs = [d for d in range(align, dim + 1, align) if dim % d == 0]
    if dim not in divs:
        divs.append(dim)
    return sorted(set(divs), reverse=True)


def _pick_tile(dim, cap, align):
    for d in _aligned_divisors(dim, align):
        if d <= cap:
            return d
    return dim


def _vmem_budget():
    try:
        cap = int(pltpu.get_tpu_info().vmem_capacity_bytes)
    except Exception:
        cap = 64 * 1024 * 1024        # conservative default: v7x has 64 MiB / TensorCore
    budget = int(cap * 0.6)           # target for the double-buffered working set
    limit = min(int(cap * 0.75), 100 * 1024 * 1024)
    return budget, limit


# ---------------------------------------------------------------------------
# Wrapper
# ---------------------------------------------------------------------------

def selector_block(x, x_2, weight, bias, *, tm=None, tn=None, tk=None,
                   compute_dtype=jnp.bfloat16, out_dtype=None):
    """Fused SelectorBlock forward.

    x, x_2 : (B, D) activations.   weight : (D, D) PyTorch (out, in) layout.   bias : (D,)
    compute_dtype : dtype fed to the MXU (default bfloat16; accumulation and the whole
        epilogue stay f32).  NOTE: with bf16 operands, `a` (hence `explain` and the
        sigmoid gate) carry bf16-matmul rounding, and the residual `x` is bf16-rounded.
    out_dtype : output dtype (default x.dtype; pass bfloat16 to halve writeback bytes).
    Returns (out, explain), both (B, D).
    """
    B, D = x.shape
    assert weight.shape == (D, D) and bias.shape == (D,) and x_2.shape == (B, D)
    if out_dtype is None:
        out_dtype = x.dtype

    cd = jnp.dtype(compute_dtype).itemsize
    x2b = jnp.dtype(x_2.dtype).itemsize
    ob = jnp.dtype(out_dtype).itemsize
    budget, vmem_limit = _vmem_budget()

    x_mm = x.astype(compute_dtype)
    # One-time wrapper-side transpose to (in, out) layout -> canonical contraction in
    # the kernel, no risk of per-tile XLU transposes.
    w_t = jnp.asarray(weight, compute_dtype).T
    b2d = bias.reshape(1, D).astype(jnp.float32)

    use_fast = (tk is None) or (tk >= D)
    if use_fast:
        def ws(tm_, tn_):   # double-buffered working set of the fused full-K kernel
            per = tm_ * D * cd + tn_ * D * cd + tn_ * 4 + tm_ * tn_ * (x2b + 2 * ob)
            return 2 * per

        tm_cands = [tm] if tm is not None else \
            ([t for t in _aligned_divisors(B, 8) if t <= 1024] or [B])
        tn_cands = [tn] if tn is not None else \
            ([t for t in _aligned_divisors(D, 128) if t <= 1024] or [D])

        choice = None
        for tn_ in tn_cands:                 # prefer collapsing N first
            for tm_ in tm_cands:             # then the largest row block that fits
                if ws(tm_, tn_) <= budget:
                    choice = (tm_, tn_)
                    break
            if choice is not None:
                break

        if choice is None:
            use_fast = False                 # D too large: fall back to K tiling
        else:
            tm_f, tn_f = choice
            # Keep >= 2 parallel blocks so v7x's two TensorCores both get work.
            if tm is None and (B // tm_f) * (D // tn_f) < 2:
                for cand in tm_cands:
                    if cand < tm_f and (B // cand) * (D // tn_f) >= 2:
                        tm_f = cand
                        break
            assert B % tm_f == 0 and D % tn_f == 0

    if use_fast:
        grid = (B // tm_f, D // tn_f)
        kernel = functools.partial(_fused_kernel, tn=tn_f)
        return pl.pallas_call(
            kernel,
            out_shape=(jax.ShapeDtypeStruct((B, D), out_dtype),
                       jax.ShapeDtypeStruct((B, D), out_dtype)),
            grid_spec=pltpu.PrefetchScalarGridSpec(
                num_scalar_prefetch=0,
                grid=grid,
                in_specs=[
                    pl.BlockSpec((tm_f, D), lambda i, j: (i, 0)),     # x (compute dtype)
                    pl.BlockSpec((D, tn_f), lambda i, j: (0, j)),     # W^T (in, out)
                    pl.BlockSpec((1, tn_f), lambda i, j: (0, j)),     # bias
                    pl.BlockSpec((tm_f, tn_f), lambda i, j: (i, j)),  # x_2
                ],
                out_specs=[
                    pl.BlockSpec((tm_f, tn_f), lambda i, j: (i, j)),  # out
                    pl.BlockSpec((tm_f, tn_f), lambda i, j: (i, j)),  # explain
                ],
            ),
            compiler_params=pltpu.CompilerParams(
                dimension_semantics=("parallel", "parallel"),
                vmem_limit_bytes=vmem_limit,
            ),
        )(x_mm, w_t, b2d, x_2)

    # ---------------- K-tiled fallback (very large D) ----------------
    tm_k = tm if tm is not None else _pick_tile(B, 256, 8)
    tn_k = tn if tn is not None else _pick_tile(D, 512, 128)
    tk_k = tk if tk is not None else _pick_tile(D, 512, 128)
    assert B % tm_k == 0 and D % tn_k == 0 and D % tk_k == 0
    grid = (B // tm_k, D // tn_k, D // tk_k)
    return pl.pallas_call(
        _ktiled_kernel,
        out_shape=(jax.ShapeDtypeStruct((B, D), out_dtype),
                   jax.ShapeDtypeStruct((B, D), out_dtype)),
        grid_spec=pltpu.PrefetchScalarGridSpec(
            num_scalar_prefetch=0,
            grid=grid,
            in_specs=[
                pl.BlockSpec((tm_k, tk_k), lambda i, j, k: (i, k)),   # x (matmul operand)
                pl.BlockSpec((tk_k, tn_k), lambda i, j, k: (k, j)),   # W^T
                pl.BlockSpec((1, tn_k), lambda i, j, k: (0, j)),      # bias
                pl.BlockSpec((tm_k, tn_k), lambda i, j, k: (i, j)),   # x (residual)
                pl.BlockSpec((tm_k, tn_k), lambda i, j, k: (i, j)),   # x_2
            ],
            out_specs=[
                pl.BlockSpec((tm_k, tn_k), lambda i, j, k: (i, j)),   # out
                pl.BlockSpec((tm_k, tn_k), lambda i, j, k: (i, j)),   # explain
            ],
            scratch_shapes=[pltpu.VMEM((tm_k, tn_k), jnp.float32)],
        ),
        compiler_params=pltpu.CompilerParams(
            dimension_semantics=("parallel", "parallel", "arbitrary"),
            vmem_limit_bytes=vmem_limit,
        ),
    )(x_mm, w_t, b2d, x, x_2)


# ---------------------------------------------------------------------------
# Reference + demo
# ---------------------------------------------------------------------------

def reference(x, x_2, weight, bias):
    a = jnp.maximum(
        jnp.matmul(x, weight.T, precision=lax.Precision.HIGHEST) + bias, 0.0)
    s = jnp.where(a > 0.0, jax.nn.sigmoid(a), 0.0)
    out = (x + x * s) * x_2
    explain = x_2 + a
    return out, explain


if __name__ == "__main__":
    key = jax.random.PRNGKey(0)
    kx, kx2, kw, kb = jax.random.split(key, 4)

    batch, input_size = 16, 256         # lane-dense hidden size (multiple of 128)

    bound = float(1.0 / (input_size ** 0.5))
    weight = jax.random.uniform(kw, (input_size, input_size), jnp.float32,
                                minval=-bound, maxval=bound)
    bias = jax.random.uniform(kb, (input_size,), jnp.float32,
                              minval=-bound, maxval=bound)
    x = jax.random.normal(kx, (batch, input_size), jnp.float32)
    x_2 = jax.random.normal(kx2, (batch, input_size), jnp.float32)

    ref_out, ref_explain = reference(x, x_2, weight, bias)
    pre_act = jnp.matmul(x, weight.T, precision=lax.Precision.HIGHEST) + bias

    # --- f32 operands, fused full-K path; tn=128 exercises the residual lane slice ---
    out, explain = selector_block(x, x_2, weight, bias, tm=8, tn=128,
                                  compute_dtype=jnp.float32)
    out, explain = jax.block_until_ready((out, explain))
    assert out.shape == (batch, input_size) and explain.shape == (batch, input_size)
    # `out` tolerance covers the EUP approx-reciprocal in the sigmoid; `explain`
    # never touches it so it stays tight.
    assert jnp.allclose(out, ref_out, atol=2e-2, rtol=1e-2), "out mismatch (f32 fused)"
    assert jnp.allclose(explain, ref_explain, atol=1e-4, rtol=1e-4), \
        "explain mismatch (f32 fused)"

    # --- f32, K-tiled fallback path (grid (2, 2, 2) with accumulator scratch) --------
    out_kt, explain_kt = selector_block(x, x_2, weight, bias, tm=8, tn=128, tk=128,
                                        compute_dtype=jnp.float32)
    out_kt, explain_kt = jax.block_until_ready((out_kt, explain_kt))
    assert jnp.allclose(out_kt, ref_out, atol=2e-2, rtol=1e-2), "out mismatch (f32 k-tiled)"
    assert jnp.allclose(explain_kt, ref_explain, atol=1e-4, rtol=1e-4), \
        "explain mismatch (f32 k-tiled)"

    # --- default path: bf16 operands, f32 accumulate/epilogue, auto tiles (tn = D) ---
    out_bf, explain_bf = selector_block(x, x_2, weight, bias)
    out_bf, explain_bf = jax.block_until_ready((out_bf, explain_bf))
    # The gate s = where(a > 0, sigmoid(a), 0) jumps from 0 to ~0.5 at a == 0, so bf16
    # matmul rounding legitimately flips it for pre-activations near zero.  Compare
    # elementwise away from that discontinuity (no tolerance is meaningful at it).
    near_gate = jnp.abs(pre_act) < 0.1
    ok = jnp.abs(out_bf - ref_out) <= 0.25 + 0.1 * jnp.abs(ref_out)
    assert bool(jnp.all(ok | near_gate)), "out mismatch (bf16)"
    assert jnp.allclose(explain_bf, ref_explain, atol=0.1, rtol=0.05), \
        "explain mismatch (bf16)"

    print("KERNEL_OK")
</pallas_src>

<mosaic_0001>
module attributes {stable_mosaic.version = 11 : i64} {
  func.func @_fused_kernel(%arg0: i32, %arg1: i32, %arg2: memref<8x256xf32, #tpu.memory_space<vmem>>, %arg3: memref<256x128xf32, #tpu.memory_space<vmem>>, %arg4: memref<1x128xf32, #tpu.memory_space<vmem>>, %arg5: memref<8x128xf32, #tpu.memory_space<vmem>>, %arg6: memref<8x128xf32, #tpu.memory_space<vmem>>, %arg7: memref<8x128xf32, #tpu.memory_space<vmem>>) attributes {dimension_semantics = [#tpu.dimension_semantics<parallel>, #tpu.dimension_semantics<parallel>], iteration_bounds = array<i64: 2, 2>, scalar_prefetch = 0 : i64, scratch_operands = 0 : i64, tpu.core_type = #tpu.core_type<tc>, window_params = [{transform_indices = @transform_0, window_bounds = array<i64: 8, 256>}, {transform_indices = @transform_1, window_bounds = array<i64: 256, 128>}, {transform_indices = @transform_2, window_bounds = array<i64: 1, 128>}, {transform_indices = @transform_3, window_bounds = array<i64: 8, 128>}, {transform_indices = @transform_4, window_bounds = array<i64: 8, 128>}, {transform_indices = @transform_5, window_bounds = array<i64: 8, 128>}]} {
    %c0 = arith.constant 0 : index
    %c0_0 = arith.constant 0 : index
    %0 = vector.load %arg2[%c0, %c0_0] : memref<8x256xf32, #tpu.memory_space<vmem>>, vector<8x256xf32>
    %c0_1 = arith.constant 0 : index
    %c0_2 = arith.constant 0 : index
    %1 = vector.load %arg3[%c0_1, %c0_2] : memref<256x128xf32, #tpu.memory_space<vmem>>, vector<256x128xf32>
    %cst = arith.constant dense<0.000000e+00> : vector<8x128xf32>
    %2 = tpu.matmul %0, %1, %cst {dimension_numbers = #tpu.dot_dimension_numbers<[1], [0], [0], [1], [0, 0, 1, 1], [], []>} : vector<8x256xf32>, vector<256x128xf32>, vector<8x128xf32> -> vector<8x128xf32>
    %c128_i32 = arith.constant 128 : i32
    %3 = arith.muli %arg1, %c128_i32 : i32
    %4 = tpu.assume_multiple %3, 128 : i32
    %c0_3 = arith.constant 0 : index
    %5 = arith.index_cast %4 : i32 to index
    %6 = vector.load %arg2[%c0_3, %5] : memref<8x256xf32, #tpu.memory_space<vmem>>, vector<8x128xf32>
    %c0_4 = arith.constant 0 : index
    %c0_5 = arith.constant 0 : index
    %7 = vector.load %arg4[%c0_4, %c0_5] : memref<1x128xf32, #tpu.memory_space<vmem>>, vector<1x128xf32>
    %c0_6 = arith.constant 0 : index
    %c0_7 = arith.constant 0 : index
    %8 = vector.load %arg5[%c0_6, %c0_7] : memref<8x128xf32, #tpu.memory_space<vmem>>, vector<8x128xf32>
    %9 = vector.broadcast %7 : vector<1x128xf32> to vector<8x128xf32>
    %10 = arith.addf %2, %9 : vector<8x128xf32>
    %cst_8 = arith.constant 0.000000e+00 : f32
    %11 = vector.broadcast %cst_8 : f32 to vector<8x128xf32>
    %12 = arith.maximumf %10, %11 : vector<8x128xf32>
    %cst_9 = arith.constant 0.000000e+00 : f32
    %13 = vector.broadcast %cst_9 : f32 to vector<8x128xf32>
    %14 = arith.cmpf ogt, %12, %13 : vector<8x128xf32>
    %cst_10 = arith.constant 0.000000e+00 : f32
    %15 = vector.broadcast %cst_10 : f32 to vector<8x128xf32>
    %16 = arith.subf %15, %12 : vector<8x128xf32>
    %17 = math.exp %16 : vector<8x128xf32>
    %cst_11 = arith.constant 1.000000e+00 : f32
    %18 = vector.broadcast %cst_11 : f32 to vector<8x128xf32>
    %19 = arith.addf %18, %17 : vector<8x128xf32>
    %20 = tpu.reciprocal %19 {approx = true} : vector<8x128xf32> -> vector<8x128xf32>
    %cst_12 = arith.constant 0.000000e+00 : f32
    %21 = vector.broadcast %cst_12 : f32 to vector<8x128xf32>
    %22 = arith.select %14, %20, %21 : vector<8x128xi1>, vector<8x128xf32>
    %cst_13 = arith.constant 1.000000e+00 : f32
    %23 = vector.broadcast %cst_13 : f32 to vector<8x128xf32>
    %24 = arith.addf %23, %22 : vector<8x128xf32>
    %25 = arith.mulf %6, %24 : vector<8x128xf32>
    %26 = arith.mulf %25, %8 : vector<8x128xf32>
    %c0_14 = arith.constant 0 : index
    %c0_15 = arith.constant 0 : index
    %27 = vector.load %arg6[%c0_14, %c0_15] : memref<8x128xf32, #tpu.memory_space<vmem>>, vector<8x128xf32>
    tpu.vector_store %arg6[%c0_14, %c0_15], %26 {strides = array<i32>} : memref<8x128xf32, #tpu.memory_space<vmem>>, vector<8x128xf32>,
    %28 = arith.addf %8, %12 : vector<8x128xf32>
    %c0_16 = arith.constant 0 : index
    %c0_17 = arith.constant 0 : index
    %29 = vector.load %arg7[%c0_16, %c0_17] : memref<8x128xf32, #tpu.memory_space<vmem>>, vector<8x128xf32>
    tpu.vector_store %arg7[%c0_16, %c0_17], %28 {strides = array<i32>} : memref<8x128xf32, #tpu.memory_space<vmem>>, vector<8x128xf32>,
    return
  }
  func.func @transform_0(%arg0: i32, %arg1: i32) -> (i32, i32) {
    %c0_i32 = arith.constant 0 : i32
    %c0_i32_0 = arith.constant 0 : i32
    return %arg0, %c0_i32 : i32, i32
  }
  func.func @transform_1(%arg0: i32, %arg1: i32) -> (i32, i32) {
    %c0_i32 = arith.constant 0 : i32
    %c0_i32_0 = arith.constant 0 : i32
    return %c0_i32, %arg1 : i32, i32
  }
  func.func @transform_2(%arg0: i32, %arg1: i32) -> (i32, i32) {
    %c0_i32 = arith.constant 0 : i32
    %c0_i32_0 = arith.constant 0 : i32
    return %c0_i32, %arg1 : i32, i32
  }
  func.func @transform_3(%arg0: i32, %arg1: i32) -> (i32, i32) {
    %c0_i32 = arith.constant 0 : i32
    return %arg0, %arg1 : i32, i32
  }
  func.func @transform_4(%arg0: i32, %arg1: i32) -> (i32, i32) {
    %c0_i32 = arith.constant 0 : i32
    return %arg0, %arg1 : i32, i32
  }
  func.func @transform_5(%arg0: i32, %arg1: i32) -> (i32, i32) {
    %c0_i32 = arith.constant 0 : i32
    return %arg0, %arg1 : i32, i32
  }
}

</mosaic_0001>

<bundles_post_ra>
// kernel: tpu_custom_call.1
= control target key start
LH: loop header
LB: loop body
LE: loop exit
PB: predicated region body
PF: predicated region fallthrough
CT: control target
= control target key end

     0   :  { %s1620_s0 = inlined_call_operand.hbm [shape: f32[16,256], index: 0, kind: input, shape index: {}]   ;;  %s1621_s1 = inlined_call_operand.hbm [shape: f32[256,256], index: 1, kind: input, shape index: {}]   ;;  %s1622_s2 = inlined_call_operand.vmem [shape: f32[1,256], index: 2, kind: input, shape index: {}]   ;;  %s1623_s3 = inlined_call_operand.hbm [shape: f32[16,256], index: 3, kind: input, shape index: {}]   ;;  %s1624_s4 = inlined_call_operand.hbm [shape: f32[16,256], index: 4, kind: output, shape index: {0}]   ;;  %s1625_s5 = inlined_call_operand.hbm [shape: f32[16,256], index: 5, kind: output, shape index: {1}]  }
   0x1   :  { %1641 = sst [smem:[#allocation24_spill]] %s1620_s0 }
   0x2   :  { %1642 = sst [smem:[#allocation25_spill]] %s1621_s1 }
   0x3   :  { %1643 = sst [smem:[#allocation26_spill]] %s1622_s2 }
   0x4   :  { %1644 = sst [smem:[#allocation27_spill]] %s1624_s4 }
   0x5   :  { %1645 = sst [smem:[#allocation28_spill]] %s1625_s5 }
   0x6   :  { %11 = vsyncpa [#allocation3], 0 }
   0x7   :  { %13 = vsyncpa [#allocation3 + $0x1], 0 }
   0x8   :  { %14 = vsyncpa [#allocation6], 0 }
   0x9   :  { %16 = vsyncpa [#allocation6 + $0x1], 0 }
   0xa   :  { %17 = vsyncpa [#allocation4], 0 }
   0xb   :  { %19 = vsyncpa [#allocation4 + $0x1], 0 }
   0xc   :  { %20 = vsyncpa [#allocation10], 0 }
   0xd   :  { %22 = vsyncpa [#allocation10 + $0x1], 0  ;;  %s1219_s18 = smov 0   ;;  %s1221_s19 = smov 0  }
   0xe   :  { %s1223_s20 = smov 0   ;;  %s1225_s21 = smov 0  }
   0xf   :  { %s1227_s22 = smov 0   ;;  %s1229_s23 = smov 0  }
  0x10   :  { %s1231_s24 = smov 0   ;;  %s1233_s25 = smov 0  }
  0x11   :  { %s1235_s26 = smov 0   ;;  %s1237_s27 = smov 0  }
  0x12   :  { %s1239_s28 = smov 0   ;;  %s1241_s29 = smov 0  }
  0x13   :  { %s1243_s30 = smov 0   ;;  %s1245_s6 = smov 0  }
  0x14 LB: > { %1646 = sst [smem:[#allocation16_spill]] %s1143_s22  ;;  %p1636_p0 = scmp.eq.s32.totalorder %s1179_s6, 0  ;;  %s1179_s6 = sphi %s1245_s6, %s28_s6   ;;  %s1175_s30 = sphi %s1243_s30, %s1692_s30   ;;  %s1171_s29 = sphi %s1241_s29, %s1701_s29   ;;  %s1167_s28 = sphi %s1239_s28, %s1690_s28   ;;  %s1163_s27 = sphi %s1237_s27, %s1700_s27   ;;  %s1159_s26 = sphi %s1235_s26, %s1699_s26   ;;  %s1155_s25 = sphi %s1233_s25, %s1698_s25   ;;  %s1151_s24 = sphi %s1231_s24, %s1689_s24   ;;  %s1147_s23 = sphi %s1229_s23, %s1697_s23   ;;  %s1143_s22 = sphi %s1227_s22, %s1696_s22   ;;  %s1139_s21 = sphi %s1225_s21, %s1688_s21   ;;  %s1135_s20 = sphi %s1223_s20, %s1695_s20   ;;  %s1131_s19 = sphi %s1221_s19, %s1694_s19   ;;  %s1127_s18 = sphi %s1219_s18, %s1693_s18  }
  0x15   : > { %1647 = sst [smem:[#allocation17_spill]] %s1155_s25  ;;  %p80_p1 = scmp.ne.s32.totalorder %s1147_s23, %s1143_s22 }
  0x16   : > { %1648 = sst [smem:[#allocation18_spill]] %s1163_s27  ;;  %p86_p2 = scmp.ne.s32.totalorder %s1143_s22, %s1139_s21 }
  0x17   : > { %1649 = sst [smem:[#allocation19_spill]] %s1167_s28  ;;  %p82_p3 = por %p80_p1, %p1636_p0 }
  0x18   : > { %1650 = sst [smem:[#allocation20_spill]] %s1175_s30  ;;  %p792_p4 = scmp.lt.s32.totalorder %s1179_s6, 4 }
  0x19   : > { %s239_s9 = sand.u32 1, %s1179_s6   ;;  %s241_s10 = sand.u32 1, %s1147_s23  }
  0x1a   : > { %s707_s11 = sshll.u32 %s241_s10, 8  ;;  %s708_s12 = sshll.u32 %s1171_s29, 7 }
  0x1b   : > { %s1651_s1 = sld [smem:[#allocation25_spill]]  ;;  %s243_s16 = scalar_lea.vmem [#allocation5], %s707_s11 }
  0x1c   : > { %s249_s17 = sshll.u32 %s243_s16, 4  ;;  %p1307_p5 = pnand %p792_p4, %p82_p3  ;;  %s250_s17 = int_to_ptr.vmem [resolvable:$true] %s249_s17 }
  0x1d   : > { %s1311_s8 = scalar_lea.sflag [#allocation6], %s239_s9  ;;  %s926_s4 = scalar_lea.vmem %s250_s17, 4096 }
  0x1e   : > { %p915_p6 = pneg %p1307_p5  ;;  %p927_p7 = scmp.ne.s32.totalorder %s250_s17, %s926_s4 }
  0x1f   : > { %s1181_s10 = smov [#allocation5]  }
  0x20   : > { %p929_p8 = pnand %p927_p7, %p915_p6  ;;  %s931_s13 = sshll.u32 %s1181_s10, 4  ;;  %s932_s13 = int_to_ptr.vmem [resolvable:$false] %s931_s13 }
  0x21   : > { %s248_s15 = scalar_lea.hbm %s1651_s1, %s708_s12  ;;  %s933_s11 = scalar_lea.vmem %s932_s13, 8192 }
  0x22   : > { %p930_p9 = pneg %p929_p8  ;;  %p934_p10 = scmp.lt.s32.totalorder %s250_s17, %s932_s13 }
  0x23   : > { %p935_p11 = scmp.lt.s32.totalorder %s933_s11, %s926_s4 }
  0x25   : > { %p936_p12 = por %p935_p11, %p934_p10 }
  0x27   : > { %p937_p13 = pnand %p936_p12, %p930_p9 }
  0x29   : > { %940 = shalt.err (!%p937_p13)
}
  0x2a   : > { %s1182_s12 = smov 256   ;;  %s1183_s4 = smov 128  }
  0x2b   : > { %s1184_s9 = smov 8   ;;  %p712_p1 = scmp.ge.s32.totalorder %s1179_s6, 1 }
  0x2c   : > { %781 = dma.hbm_to_vmem [thread:$0]  (!%p1307_p5), %s248_s15, 4096, %s250_s17, %s1311_s8, %s1182_s12, %s1183_s4, %s1184_s9  }
  0x2d   : > { %p283_p3 = scmp.lt.s32.totalorder %s1179_s6, 5  ;;  %s1325_s16 = sadd.s32 4294967295, %s1179_s6  }
  0x2e   : > { %s1654_s10 = sadd.s32 1, %s1171_s29  ;;  %s40_s7 = sadd.s32 1, %s1175_s30 }
  0x2f   : > { %p1320_p6 = pnand %p712_p1, %p283_p3  ;;  %p38_p7 = scmp.ge.s32.totalorder %s1654_s10, 2 }
  0x30   : > { %s47_s13 = sadd.s32 1, %s1159_s26  ;;  %p54_p5 = scmp.ne.s32.totalorder %s1159_s26, %s1155_s25 }
  0x31   : > { %s1655_s15 = smov %s1654_s10  ;;  %s1705_s7 = smov (!%p38_p7, %s40_s7), %s1175_s30 }
  0x32   : > { %s1703_s15 = smov (%p38_p7, %s1655_s15), 0  ;;  %p1340_p8 = por %p1636_p0, %p54_p5 }
  0x33   : > { %1656 = sst [smem:[#allocation21_spill]] %s1703_s15  ;;  %p60_p9 = scmp.ne.s32.totalorder %s1155_s25, %s1151_s24 }
  0x34   : > { %p42_p10 = scmp.ge.s32.totalorder %s1705_s7, 2  ;;  %p1635_p11 = scmp.eq.s32.totalorder %s1325_s16, 0 }
  0x35   : > { %s70_s11 = ssub.s32 %s1171_s29, %s1703_s15  ;;  %s220_s12 = sand.u32 1, %s1159_s26  }
  0x36   : > { %s1707_s7 = smov (%p42_p10, %s1705_s7), 0  ;;  %p1354_p12 = por %p1635_p11, %p60_p9 }
  0x37   : > { %1658 = sst [smem:[#allocation22_spill]] %s1707_s7  ;;  %p71_p13 = scmp.eq.s32.totalorder %s70_s11, 0 }
  0x38   : > { %s1659_s4 = scalar_select %p1354_p12, 1, 0 }
  0x39   : > { %s44_s9 = ssub.s32 %s1175_s30, %s1707_s7  ;;  %p1365_p1 = por %p86_p2, %p1635_p11 }
  0x3a   : > { %1660 = sst [smem:[#allocation23_spill]] %s1659_s4  ;;  %p45_p3 = scmp.eq.s32.totalorder %s44_s9, 0 }
  0x3b   : > { %s124_s10 = sor.u32 %s70_s11, %s44_s9  ;;  %s1662_s1 = sadd.s32 1, %s1147_s23 }
  0x3c   : > { %s1372_s15 = scalar_select %p71_p13, %s1147_s23, %s1662_s1  }
  0x3d   : > { %s1375_s5 = scalar_select %p45_p3, %s1159_s26, %s47_s13  }
  0x3e   : > { %p1377_p7 = scmp.eq.s32.totalorder %s124_s10, 0  ;;  %s704_s28 = sshll.u32 %s220_s12, 4 }
  0x3f   : > { %s729_s27 = sshll.u32 %s1175_s30, 8  ;;  %s1664_s0 = sld [smem:[#allocation24_spill]] }
  0x40   : > { %s224_s22 = scalar_lea.vmem [#allocation2], %s704_s28  ;;  %p1389_p2 = pnand %p792_p4, %p1340_p8 }
  0x41   : > { %s232_s25 = sshll.u32 %s224_s22, 4  ;;  %s221_s1 = scalar_lea.sflag [#allocation3], %s220_s12  ;;  %s233_s25 = int_to_ptr.vmem [resolvable:$true] %s232_s25 }
  0x42   : > { %p943_p5 = pneg %p1389_p2  ;;  %s954_s13 = scalar_lea.vmem %s233_s25, 256 }
  0x43   : > { %p955_p9 = scmp.ne.s32.totalorder %s233_s25, %s954_s13  ;;  %s1185_s9 = smov [#allocation2]  }
  0x44   : > { %s959_s7 = sshll.u32 %s1185_s9, 4  ;;  %s960_s7 = int_to_ptr.vmem [resolvable:$false] %s959_s7 }
  0x45   : > { %s230_s21 = scalar_lea.hbm %s1664_s0, %s729_s27  ;;  %p957_p10 = pnand %p955_p9, %p943_p5 }
  0x46   : > { %s961_s27 = scalar_lea.vmem %s960_s7, 512  ;;  %p962_p3 = scmp.lt.s32.totalorder %s233_s25, %s960_s7 }
  0x47   : > { %p958_p13 = pneg %p957_p10  ;;  %p963_p11 = scmp.lt.s32.totalorder %s961_s27, %s954_s13 }
  0x49   : > { %p964_p0 = por %p963_p11, %p962_p3 }
  0x4b   : > { %p965_p8 = pnand %p964_p0, %p958_p13 }
  0x4d   : > { %968 = shalt.err (!%p965_p8)
}
  0x4e   : > { %778 = dma.hbm_to_vmem [thread:$0]  (!%p1389_p2), %s230_s21, 256, %s233_s25, %s221_s1  }
  0x4f   : > { %s701_s22 = sadd.s32 4294967294, %s1179_s6   ;;  %s127_s28 = sadd.s32 1, %s1135_s20 }
  0x50   : > { %s1402_s17 = scalar_select %p1377_p7, %s1135_s20, %s127_s28  }
  0x51   : > { %p134_p0 = scmp.ne.s32.totalorder %s1135_s20, %s1131_s19  ;;  %p140_p11 = scmp.ne.s32.totalorder %s1131_s19, %s1127_s18 }
  0x52   : > { %p166_p5 = scmp.eq.s32.totalorder %s1325_s16, 3  ;;  %p172_p9 = scmp.eq.s32.totalorder %s701_s22, 3 }
  0x53   : > { %p1666_p10 = scmp.eq.s32.totalorder %s1179_s6, 0  ;;  %p1668_p3 = scmp.eq.s32.totalorder %s1325_s16, 0 }
  0x54   : > { %p1421_p2 = por %p166_p5, %p134_p0  ;;  %p1425_p7 = por %p172_p9, %p140_p11 }
  0x55   : > { %p1411_p13 = por %p134_p0, %p1666_p10  ;;  %p1417_p8 = por %p140_p11, %p1668_p3 }
  0x56   : > { %s1670_s2 = scalar_select %p1421_p2, 1, 0 }
  0x57   : > { %s1669_s4 = scalar_select %p1417_p8, 1, 0 }
  0x58   : > { %s1671_s25 = scalar_select %p1425_p7, 1, 0 }
  0x59   : > { %s267_s10 = sand.u32 1, %s1135_s20   ;;  %s710_s21 = sshll.u32 %s1175_s30, 1 }
  0x5a   : > { %s709_s11 = sshll.u32 %s267_s10, 3  ;;  %s274_s1 = sadd.s32 %s1171_s29, %s710_s21 }
  0x5b   : > { %s711_s13 = sshll.u32 %s274_s1, 7  ;;  %s269_s22 = scalar_lea.vmem [#allocation7], %s709_s11 }
  0x5c   : > { %s276_s27 = scalar_lea.hbm %s1623_s3, %s711_s13  ;;  %s278_s28 = sshll.u32 %s269_s22, 4  ;;  %s279_s28 = int_to_ptr.vmem [resolvable:$true] %s278_s28 }
  0x5d   : > { %p1439_p0 = pnand %p792_p4, %p1411_p13  ;;  %s982_s30 = scalar_lea.vmem %s279_s28, 128 }
  0x5e   : > { %p983_p5 = scmp.ne.s32.totalorder %s279_s28, %s982_s30  ;;  %s1186_s10 = smov [#allocation7]  }
  0x5f   : > { %p971_p11 = pneg %p1439_p0  ;;  %s987_s21 = sshll.u32 %s1186_s10, 4  ;;  %s988_s21 = int_to_ptr.vmem [resolvable:$false] %s987_s21 }
  0x60   : > { %s989_s1 = scalar_lea.vmem %s988_s21, 256  ;;  %p990_p3 = scmp.lt.s32.totalorder %s279_s28, %s988_s21 }
  0x61   : > { %p985_p9 = pnand %p983_p5, %p971_p11  ;;  %p991_p7 = scmp.lt.s32.totalorder %s989_s1, %s982_s30 }
  0x63   : > { %p986_p10 = pneg %p985_p9  ;;  %p992_p2 = por %p991_p7, %p990_p3 }
  0x65   : > { %p993_p8 = pnand %p992_p2, %p986_p10 }
  0x67   : > { %996 = shalt.err (!%p993_p8)
}
  0x68   : > { %784 = dma.hbm_to_vmem [thread:$0]  (!%p1439_p0), %s276_s27, 128, %s279_s28, %s1311_s8  }
  0x69   : > { %287 = sbr.rel (%p1320_p6) target bundleno = 427 (0x1ab), region = 36  ;;  %s1673_s12 = sld [smem:[#allocation17_spill]] (!%p1320_p6) }
  0x6f   : > { %s289_s13 = sand.u32 1, %s1673_s12  }
  0x70   : > { %s713_s9 = sshll.u32 %s289_s13, 4  ;;  %s290_s7 = scalar_lea.sflag [#allocation3], %s289_s13 }
  0x71   : > { %s1451_s22 = scalar_lea.vmem [#allocation2], %s713_s9 }
  0x72   : > { %1106 = dma.done.wait (%p1354_p12), %s290_s7, 256  }
  0x73   : > { %1108 = vsyncadd (%p1354_p12), %s290_s7, 4294967040  ;;  %s1675_s30 = sld [smem:[#allocation16_spill]]  ;;  %s298_s0 = sand.u32 1, %s1325_s16  }
  0x74   : > { %s299_s14 = scalar_lea.sflag [#allocation6], %s298_s0 }
  0x79   : > { %s300_s8 = sand.u32 1, %s1675_s30  }
  0x7a   : > { %s714_s27 = sshll.u32 %s300_s8, 8 }
  0x7b   : > { %s1459_s28 = scalar_lea.vmem [#allocation5], %s714_s27 }
  0x7c   : > { %1110 = dma.done.wait (%p1365_p1), %s299_s14, 4096  }
  0x7d   : > { %1112 = vsyncadd (%p1365_p1), %s299_s14, 4294963200  ;;  %s1466_s10 = sand.u32 1, %s1131_s19   ;;  %p1676_p4 = scmp.ne.s32.totalorder %s1669_s4, 0 }
  0x7e   : > { %s1469_s21 = sshll.u32 %s1466_s10, 3 }
  0x7f   : > { %s311_s1 = scalar_lea.vmem [#allocation7], %s1469_s21 }
  0x80   : > { %1114 = dma.done.wait (%p1676_p4), %s299_s14, 128  }
  0x81   : > { %1116 = vsyncadd (%p1676_p4), %s299_s14, 4294967168  ;;  %v392_v0 = vld [vmem:[%s1459_s28 + $0xf8] sm:$0xff]  ;;  %v391_v2 = vld [vmem:[%s1459_s28 + $0xf0] sm:$0xff]  ;;  %s1677_s16 = sld [smem:[#allocation18_spill]]  ;;  %s355_s8 = scalar_lea.vmem [#allocation9], %s1469_s21 }
  0x82   : > { %v376_v1 = vld [vmem:[%s1459_s28 + $0x78] sm:$0xff]  ;;  %730 = vmatprep.subr.mxu0 %v392_v0  ;;  %v375_v3 = vld [vmem:[%s1459_s28 + $0x70] sm:$0xff]  ;;  %v390_v4 = vld [vmem:[%s1459_s28 + $0xe8] sm:$0xff]  ;;  %s1678_s24 = sld [smem:[#allocation19_spill]]  ;;  %s527_s27 = sshll.u32 %s355_s8, 4  ;;  %s528_s27 = int_to_ptr.vmem [resolvable:$true] %s527_s27 }
  0x83   : > { %731 = vmatpush3.msra.mxu0 %v376_v1  ;;  %v374_v5 = vld [vmem:[%s1459_s28 + $0x68] sm:$0xff]  ;;  %v389_v6 = vld [vmem:[%s1459_s28 + $0xe0] sm:$0xff]  ;;  %v388_v8 = vld [vmem:[%s1459_s28 + $0xd8] sm:$0xff]  ;;  %s1679_s13 = sld [smem:[#allocation26_spill]]  ;;  %s497_s11 = scalar_lea.sflag [#allocation10], %s1466_s10 }
  0x84   : > { %732 = vmatprep.subr.mxu0 %v391_v2  ;;  %v373_v7 = vld [vmem:[%s1459_s28 + $0x60] sm:$0xff]  ;;  %v372_v9 = vld [vmem:[%s1459_s28 + $0x58] sm:$0xff]  ;;  %v387_v10 = vld [vmem:[%s1459_s28 + $0xd0] sm:$0xff]  ;;  %p1682_p1 = scmp.ne.s32.totalorder %s1670_s2, 0 }
  0x85   : > { %733 = vmatpush3.msra.mxu0 %v375_v3  ;;  %v371_v11 = vld [vmem:[%s1459_s28 + $0x50] sm:$0xff]  ;;  %v386_v12 = vld [vmem:[%s1459_s28 + $0xc8] sm:$0xff]  ;;  %v385_v15 = vld [vmem:[%s1459_s28 + $0xc0] sm:$0xff] }
  0x86   : > { %734 = vmatprep.subr.mxu0 %v390_v4  ;;  %v360_v13 = vld [vmem:[%s1451_s22 + $0x8] sm:$0xff]  ;;  %v369_v16 = vld [vmem:[%s1459_s28 + $0x40] sm:$0xff]  ;;  %v383_v19 = vld [vmem:[%s1459_s28 + $0xb0] sm:$0xff] }
  0x87   : > { %735 = vmatpush3.msra.mxu0 %v374_v5  ;;  %v370_v14 = vld [vmem:[%s1459_s28 + $0x48] sm:$0xff]  ;;  %471 = vmatprep.mubr.f32.mxu0 %v360_v13  ;;  %v384_v17 = vld [vmem:[%s1459_s28 + $0xb8] sm:$0xff]  ;;  %v367_v20 = vld [vmem:[%s1459_s28 + $0x30] sm:$0xff]  ;;  %p356_p6 = scmp.lt.s32.totalorder %s1677_s16, 1 }
  0x88   : > { %736 = vmatprep.subr.mxu0 %v389_v6  ;;  %v368_v18 = vld [vmem:[%s1459_s28 + $0x38] sm:$0xff]  ;;  %v382_v21 = vld [vmem:[%s1459_s28 + $0xa8] sm:$0xff]  ;;  %v381_v23 = vld [vmem:[%s1459_s28 + $0xa0] sm:$0xff]  ;;  %s723_s7 = sshll.u32 %s1678_s24, 1  ;;  %s1680_s24 = sld [smem:[#allocation28_spill]] }
  0x89   : > { %737 = vmatpush3.msra.mxu0 %v373_v7  ;;  %v366_v22 = vld [vmem:[%s1459_s28 + $0x28] sm:$0xff]  ;;  %v365_v24 = vld [vmem:[%s1459_s28 + $0x20] sm:$0xff]  ;;  %v380_v25 = vld [vmem:[%s1459_s28 + $0x98] sm:$0xff]  ;;  %s357_s4 = scalar_select %p356_p6, %s1677_s16, 1 }
  0x8a   : > { %738 = vmatprep.subr.mxu0 %v388_v8  ;;  %v364_v26 = vld [vmem:[%s1459_s28 + $0x18] sm:$0xff]  ;;  %v379_v27 = vld [vmem:[%s1459_s28 + $0x90] sm:$0xff]  ;;  %v378_v29 = vld [vmem:[%s1459_s28 + $0x88] sm:$0xff]  ;;  %s1517_s30 = sadd.s32 %s1677_s16, %s723_s7 }
  0x8b   : > { %739 = vmatpush3.msra.mxu0 %v372_v9  ;;  %v363_v28 = vld [vmem:[%s1459_s28 + $0x10] sm:$0xff]  ;;  %v362_v30 = vld [vmem:[%s1459_s28 + $0x8] sm:$0xff]  ;;  %v377_v31 = vld [vmem:[%s1459_s28 + $0x80] sm:$0xff]  ;;  %s358_s9 = scalar_lea.vmem %s1679_s13, %s357_s4  ;;  %s1640_s0 = sshll.u32 %s1517_s30, 7 }
  0x8c   : > { %740 = vmatprep.subr.mxu0 %v387_v10  ;;  %v361_v32 = vld [vmem:[%s1459_s28] sm:$0xff]  ;;  %s997_s13 = scalar_lea.vmem %s528_s27, 128 }
  0x8d   : > { %741 = vmatpush3.msra.mxu0 %v371_v11  ;;  %v359_v33 = vld [vmem:[%s1451_s22] sm:$0xff]  ;;  %p998_p12 = scmp.ne.s32.totalorder %s528_s27, %s997_s13 }
  0x8e   : > { %742 = vmatprep.subr.mxu0 %v386_v12  ;;  %v720_v35 = vld [vmem:[%s358_s9] ss:$0 sm:$0xff]  ;;  %s1681_s4 = smov %s1680_s24  ;;  %s1528_s12 = scalar_lea.hbm %s1680_s24, %s1640_s0 }
  0x8f   : > { %743 = vmatpush3.msra.mxu0 %v370_v14  ;;  %v400_v39 = vld [vmem:[%s311_s1] sm:$0xff]  ;;  %p999_p13 = pnand %p998_p12, %p1682_p1  ;;  %s1187_s1 = smov [#allocation9]  }
  0x90   : > { %744 = vmatprep.subr.mxu0 %v385_v15  ;;  %s1001_s9 = sshll.u32 %s1187_s1, 4  ;;  %s1002_s9 = int_to_ptr.vmem [resolvable:$false] %s1001_s9 }
  0x91   : > { %745 = vmatpush3.msra.mxu0 %v369_v16  ;;  %p1000_p8 = pneg %p999_p13  ;;  %s1003_s7 = scalar_lea.vmem %s1002_s9, 256 }
  0x92   : > { %746 = vmatprep.subr.mxu0 %v384_v17  ;;  %p1004_p2 = scmp.lt.s32.totalorder %s528_s27, %s1002_s9  ;;  %p1005_p7 = scmp.lt.s32.totalorder %s1003_s7, %s997_s13 }
  0x93   : > { %747 = vmatpush3.msra.mxu0 %v368_v18 }
  0x94   : > { %748 = vmatprep.subr.mxu0 %v383_v19  ;;  %p1006_p0 = por %p1005_p7, %p1004_p2 }
  0x95   : > { %749 = vmatpush3.msra.mxu0 %v367_v20 }
  0x96   : > { %750 = vmatprep.subr.mxu0 %v382_v21  ;;  %p1007_p11 = pnand %p1006_p0, %p1000_p8 }
  0x97   : > { %751 = vmatpush3.msra.mxu0 %v366_v22 }
  0x98   : > { %752 = vmatprep.subr.mxu0 %v381_v23 }
  0x99   : > { %753 = vmatpush3.msra.mxu0 %v365_v24 }
  0x9a   : > { %754 = vmatprep.subr.mxu0 %v380_v25 }
  0x9b   : > { %755 = vmatpush3.msra.mxu0 %v364_v26 }
  0x9c   : > { %756 = vmatprep.subr.mxu0 %v379_v27 }
  0x9d   : > { %757 = vmatpush3.msra.mxu0 %v363_v28 }
  0x9e   : > { %758 = vmatprep.subr.mxu0 %v378_v29 }
  0x9f   : > { %759 = vmatpush3.msra.mxu0 %v362_v30 }
  0xa0   : > { %760 = vmatprep.subr.mxu0 %v377_v31 }
  0xa1   : > { %761 = vmatpush3.msra.mxu0 %v361_v32 }
  0xa2   : > { %472 = vmatmul.mubr.f32.vlgmr.msra.gmra.mxu0 %v359_v33 }
 0x162   : > { %v762_v34 = vpop.f32.mrf.mxu0 }
 0x164   : > { %v763_v36 = vpop.f32.mrf.mxu0 }
 0x165   : > { %v764_v37 = vadd.f32 %v763_v36, %v762_v34 }
 0x167   : > { %v474_v38 = vadd.f32 %v764_v37, %v720_v35 }
 0x169   : > { %v477_v40 = vmax.f32 %v474_v38, 0.0 }
 0x16b   : > { %v479_v41 = vsub.f32 0.0, %v477_v40  ;;  %v489_v42 = vadd.f32 %v477_v40, %v400_v39 }
 0x16d   : > { %v480_v43 = vmul.f32 1.442695, %v479_v41  ;;  %490 = vst [vmem:[%s355_s8] sm:$0xff] %v489_v42 }
 0x16e   : > { %1010 = shalt.err (!%p1007_p11)
}
 0x16f   : > { %s1011_s8 = scalar_lea.hbm %s1528_s12, 128  ;;  %s1015_s24 = scalar_lea.hbm %s1681_s4, 512 }
 0x170   : > { %p1012_p5 = scmp.ne.s32.totalorder %s1528_s12, %s1011_s8  ;;  %p1016_p3 = scmp.lt.s32.totalorder %s1528_s12, %s1681_s4 }
 0x171   : > { %p1017_p4 = scmp.lt.s32.totalorder %s1015_s24, %s1011_s8 }
 0x172   : > { %p1013_p9 = pnand %p1012_p5, %p1682_p1 }
 0x173   : > { %p1018_p6 = por %p1017_p4, %p1016_p3 }
 0x174   : > { %p1014_p10 = pneg %p1013_p9 }
 0x176   : > { %p1019_p12 = pnand %p1018_p6, %p1014_p10 }
 0x178   : > { %1022 = shalt.err (!%p1019_p12)
}
 0x179   : > { %772 = dma.vmem_to_hbm [thread:$0]  (%p1682_p1), %s528_s27, 128, %s1528_s12, %s497_s11   ;;  %909 = vpow2.f32 %v480_v43  ;;  %vm478_vm0 = vcmp.gt.f32.partialorder %v477_v40, 0.0 }
 0x17a   : > { %s718_s13 = sshll.u32 %s1677_s16, 7  ;;  %s348_s8 = scalar_lea.vmem [#allocation8], %s1469_s21 }
 0x17b   : > { %s394_s0 = sshra.s32 %s718_s13, 7  ;;  %s512_s14 = sshll.u32 %s348_s8, 4  ;;  %s513_s14 = int_to_ptr.vmem [resolvable:$true] %s512_s14 }
 0x17c   : > { %s719_s9 = sshll.u32 %s394_s0, 3  ;;  %s1683_s27 = sshll.u32 %s1517_s30, 7 }
 0x17d   : > { %s397_s7 = scalar_lea.vmem %s1451_s22, %s719_s9 [#allocation2]  ;;  %s1684_s28 = sld [smem:[#allocation27_spill]] }
 0x17e   : > { %v398_v47 = vld [vmem:[%s397_s7] sm:$0xff]  ;;  %s492_s16 = scalar_lea.sflag [#allocation4], %s1466_s10  ;;  %s1023_s13 = scalar_lea.vmem %s513_s14, 128 }
 0x17f   : > { %p1024_p13 = scmp.ne.s32.totalorder %s513_s14, %s1023_s13  ;;  %s1188_s22 = smov [#allocation8]  }
 0x180   : > { %s1027_s0 = sshll.u32 %s1188_s22, 4  ;;  %s1028_s0 = int_to_ptr.vmem [resolvable:$false] %s1027_s0 }
 0x181   : > { %p1025_p8 = pnand %p1024_p13, %p1682_p1  ;;  %s1029_s21 = scalar_lea.vmem %s1028_s0, 256 }
 0x182   : > { %p1030_p7 = scmp.lt.s32.totalorder %s513_s14, %s1028_s0  ;;  %p1031_p0 = scmp.lt.s32.totalorder %s1029_s21, %s1023_s13 }
 0x183   : > { %s1685_s1 = smov %s1684_s28  ;;  %s510_s24 = scalar_lea.hbm %s1684_s28, %s1683_s27 }
 0x184   : > { %p1026_p2 = pneg %p1025_p8  ;;  %p1032_p11 = por %p1031_p0, %p1030_p7 }
 0x186   : > { %v910_v44 = vpop.eup %909  ;;  %p1033_p5 = pnand %p1032_p11, %p1026_p2 }
 0x187   : > { %v482_v45 = vadd.f32 1.0, %v910_v44 }
 0x189   : > { %911 = vrcp.f32 %v482_v45 }
 0x196   : > { %v912_v46 = vpop.eup %911 }
 0x197   : > { %v484_v48 = vsel %vm478_vm0, %v912_v46, 0.0 }
 0x198   : > { %v485_v49 = vadd.f32 1.0, %v484_v48 }
 0x19a   : > { %v486_v50 = vmul.f32 %v485_v49, %v398_v47 }
 0x19c   : > { %v487_v51 = vmul.f32 %v486_v50, %v400_v39 }
 0x19e   : > { %488 = vst [vmem:[%s348_s8] sm:$0xff] %v487_v51 }
 0x19f   : > { %1036 = shalt.err (!%p1033_p5)
}
 0x1a0   : > { %s1037_s30 = scalar_lea.hbm %s510_s24, 128  ;;  %s1041_s7 = scalar_lea.hbm %s1685_s1, 512 }
 0x1a1   : > { %p1038_p9 = scmp.ne.s32.totalorder %s510_s24, %s1037_s30  ;;  %p1042_p4 = scmp.lt.s32.totalorder %s510_s24, %s1685_s1 }
 0x1a2   : > { %p1043_p6 = scmp.lt.s32.totalorder %s1041_s7, %s1037_s30 }
 0x1a3   : > { %p1039_p10 = pnand %p1038_p9, %p1682_p1 }
 0x1a4   : > { %p1044_p12 = por %p1043_p6, %p1042_p4 }
 0x1a5   : > { %p1040_p3 = pneg %p1039_p10 }
 0x1a7   : > { %p1045_p13 = pnand %p1044_p12, %p1040_p3 }
 0x1a9   : > { %1048 = shalt.err (!%p1045_p13)
}
 0x1aa   : > { %771 = dma.vmem_to_hbm [thread:$0]  (%p1682_p1), %s513_s14, 128, %s510_s24, %s492_s16  }
 0x1ab PF: > { %p793_p8 = scmp.ge.s32.totalorder %s1179_s6, 2  ;;  %s539_s12 = sand.u32 1, %s1127_s18  }
 0x1ac   : > { %p1686_p2 = scmp.ne.s32.totalorder %s1671_s25, 0  ;;  %s540_s11 = scalar_lea.sflag [#allocation4], %s539_s12 }
 0x1ae   : > { %p786_p7 = pnand %p793_p8, %p1686_p2 }
 0x1b0   : > { %p787_p0 = pneg %p786_p7 }
 0x1b2   : > { %1118 = dma.done.wait (%p787_p0), %s540_s11, 128  }
 0x1b3   : > { %1120 = vsyncadd (%p787_p0), %s540_s11, 4294967168  ;;  %s549_s28 = scalar_lea.sflag [#allocation10], %s539_s12 }
 0x1b4   : > { %1122 = dma.done.wait (%p787_p0), %s549_s28, 128  }
 0x1b5   : > { %1124 = vsyncadd (%p787_p0), %s549_s28, 4294967168  ;;  %s28_s6 = sadd.s32 1, %s1179_s6   ;;  %s1688_s21 = sld [smem:[#allocation16_spill]] }
 0x1b6   : > { %p1573_p11 = scmp.ge.s32.totalorder %s28_s6, 6   ;;  %s1689_s24 = sld [smem:[#allocation17_spill]] }
 0x1b7   : > { %s1690_s28 = sld [smem:[#allocation20_spill]]  ;;  %s1693_s18 = smov %s1131_s19 }
 0x1b8   : > { %s1691_s14 = sld [smem:[#allocation21_spill]]  ;;  %s1694_s19 = smov %s1135_s20 }
 0x1b9   : > { %s1692_s30 = sld [smem:[#allocation22_spill]]  ;;  %s1695_s20 = smov %s1402_s17 }
 0x1ba   : > { %s1696_s22 = smov %s1147_s23  ;;  %s1697_s23 = smov %s1372_s15 }
 0x1bb   : > { %s1698_s25 = smov %s1159_s26  ;;  %s1699_s26 = smov %s1375_s5 }
 0x1bc   : > { %s1700_s27 = smov %s1171_s29  ;;  %27 = sbr.rel (!%p1573_p11) target bundleno = 20 (0x14), region = 126 }
 0x1be   : > { %s1701_s29 = smov %s1691_s14 }
 0x1c1   :  { %554 = vsyncpa [#allocation3], 1 }
 0x1c2   :  { %556 = vsyncpa [#allocation3 + $0x1], 1 }
 0x1c3   :  { %557 = vsyncpa [#allocation6], 1 }
 0x1c4   :  { %559 = vsyncpa [#allocation6 + $0x1], 1 }
 0x1c5   :  { %560 = vsyncpa [#allocation4], 1 }
 0x1c6   :  { %562 = vsyncpa [#allocation4 + $0x1], 1 }
 0x1c7   :  { %563 = vsyncpa [#allocation10], 1 }
 0x1c8   :  { %565 = vsyncpa [#allocation10 + $0x1], 1 }

</bundles_post_ra>
